<compile_context>
chip_gen: v6e
topology: v6e:2x2x1
jax: 0.10.0
libtpu: 0.0.40
codegen_flags: <defaults>
</compile_context>

<pallas_src>
import functools

import jax
import jax.numpy as jnp
from jax.experimental import pallas as pl
from jax.experimental.pallas import tpu as pltpu

N_MELS = 80
HIDDEN = 128
VOCAB = 28
OUT = VOCAB + 1          # 29 — true output width, written directly (no padding)


def _round_up(x, m):
    return (x + m - 1) // m * m


def _mlp_kernel(x_ref, w1_ref, b1_ref, w2_ref, b2_ref, o_ref, *, use_bf16):
    # x_ref: (tm, N_MELS)        w1_ref: (N_MELS, HIDDEN)   b1_ref: (1, HIDDEN)
    # w2_ref: (HIDDEN, OUT)      b2_ref: (1, OUT)           o_ref: (tm, OUT)
    mm_dtype = jnp.bfloat16 if use_bf16 else jnp.float32
    x = x_ref[...].astype(mm_dtype)            # cast in-kernel (no wrapper pass)
    w1 = w1_ref[...].astype(mm_dtype)
    h = jnp.dot(x, w1, preferred_element_type=jnp.float32)
    h = jnp.maximum(h + b1_ref[...], 0.0)      # bias + ReLU in f32
    y = jnp.dot(h.astype(mm_dtype), w2_ref[...].astype(mm_dtype),
                preferred_element_type=jnp.float32)
    y = y + b2_ref[...]
    o_ref[...] = y.astype(o_ref.dtype)


def acoustic_model_forward(x, w1, b1, w2, b2, *, tm=8192, use_bf16=True):
    """x: (B, T, N_MELS) float32 -> (B, T, OUT) float32.

    w1: (N_MELS, HIDDEN), b1: (HIDDEN,), w2: (HIDDEN, OUT), b2: (OUT,)
    (weights stored (in, out); transpose torch's (out, in) once outside).
    """
    B, T, F = x.shape
    assert F == N_MELS
    M = B * T

    # Row tile: multiple of 8, clamped to the row count; for large inputs keep
    # at least 2 grid steps so the "parallel" axis can shard across both
    # TensorCores on v7x.
    tm = _round_up(max(tm, 8), 8)
    if M > 8192:
        tm = min(tm, _round_up(pl.cdiv(M, 2), 8))
    tm = min(tm, _round_up(M, 8))
    grid = (pl.cdiv(M, tm),)

    x2 = x.reshape(M, F)                              # contiguous reshape — free
    b1r = b1.reshape(1, HIDDEN).astype(jnp.float32)
    b2r = b2.reshape(1, OUT).astype(jnp.float32)

    flops = 2 * M * (N_MELS * HIDDEN + HIDDEN * OUT)
    bytes_accessed = (
        M * N_MELS * x2.dtype.itemsize        # x read
        + M * OUT * 4                          # y write (f32)
        + (N_MELS * HIDDEN + HIDDEN * OUT + HIDDEN + OUT) * 4  # weights/biases
    )

    out2 = pl.pallas_call(
        functools.partial(_mlp_kernel, use_bf16=use_bf16),
        out_shape=jax.ShapeDtypeStruct((M, OUT), jnp.float32),
        grid_spec=pltpu.PrefetchScalarGridSpec(
            num_scalar_prefetch=0,
            grid=grid,
            in_specs=[
                pl.BlockSpec((tm, N_MELS), lambda i: (i, 0)),      # x row tile
                pl.BlockSpec((N_MELS, HIDDEN), lambda i: (0, 0)),  # w1 (resident)
                pl.BlockSpec((1, HIDDEN), lambda i: (0, 0)),       # b1 (resident)
                pl.BlockSpec((HIDDEN, OUT), lambda i: (0, 0)),     # w2 (resident)
                pl.BlockSpec((1, OUT), lambda i: (0, 0)),          # b2 (resident)
            ],
            out_specs=pl.BlockSpec((tm, OUT), lambda i: (i, 0)),
        ),
        compiler_params=pltpu.CompilerParams(
            dimension_semantics=("parallel",)),
        cost_estimate=pl.CostEstimate(
            flops=flops, transcendentals=0, bytes_accessed=bytes_accessed),
    )(x2, w1, b1r, w2, b2r)

    return out2.reshape(B, T, OUT)


def _init_params(key):
    """Deterministic init mimicking torch.nn.Linear's uniform(-1/sqrt(in), 1/sqrt(in))."""
    k1, k2, k3, k4 = jax.random.split(key, 4)
    bound1 = 1.0 / jnp.sqrt(N_MELS)
    bound2 = 1.0 / jnp.sqrt(HIDDEN)
    w1 = jax.random.uniform(k1, (N_MELS, HIDDEN), jnp.float32, -bound1, bound1)
    b1 = jax.random.uniform(k2, (HIDDEN,), jnp.float32, -bound1, bound1)
    w2 = jax.random.uniform(k3, (HIDDEN, OUT), jnp.float32, -bound2, bound2)
    b2 = jax.random.uniform(k4, (OUT,), jnp.float32, -bound2, bound2)
    return w1, b1, w2, b2


if __name__ == "__main__":
    key = jax.random.PRNGKey(0)
    kx, kp = jax.random.split(key)

    B, T = 2, 8  # small test shapes; M = 16 rows (single ragged-friendly tile)
    x = jax.random.normal(kx, (B, T, N_MELS), jnp.float32)
    w1, b1, w2, b2 = _init_params(kp)

    # pure-JAX f32 reference
    ref = jnp.maximum(x @ w1 + b1, 0.0) @ w2 + b2

    # f32 path: near-exact match
    out_f32 = jax.block_until_ready(
        acoustic_model_forward(x, w1, b1, w2, b2, use_bf16=False))
    assert out_f32.shape == (B, T, OUT)
    assert jnp.allclose(out_f32, ref, atol=1e-5, rtol=1e-5), "f32 mismatch vs reference"

    # bf16 fast path (default): looser tolerance vs f32 reference
    out_bf16 = jax.block_until_ready(
        acoustic_model_forward(x, w1, b1, w2, b2, use_bf16=True))
    assert out_bf16.shape == (B, T, OUT)
    assert jnp.allclose(out_bf16, ref, atol=3e-2, rtol=3e-2), "bf16 mismatch vs reference"

    print("KERNEL_OK")
</pallas_src>

<mosaic_0001>
module attributes {stable_mosaic.version = 11 : i64} {
  func.func @_mlp_kernel(%arg0: i32, %arg1: memref<16x80xf32, #tpu.memory_space<vmem>>, %arg2: memref<80x128xf32, #tpu.memory_space<vmem>>, %arg3: memref<1x128xf32, #tpu.memory_space<vmem>>, %arg4: memref<128x29xf32, #tpu.memory_space<vmem>>, %arg5: memref<1x29xf32, #tpu.memory_space<vmem>>, %arg6: memref<16x29xf32, #tpu.memory_space<vmem>>) attributes {dimension_semantics = [#tpu.dimension_semantics<parallel>], iteration_bounds = array<i64: 1>, scalar_prefetch = 0 : i64, scratch_operands = 0 : i64, tpu.core_type = #tpu.core_type<tc>, window_params = [{transform_indices = @transform_0, window_bounds = array<i64: 16, 80>}, {pipeline_mode = #tpu.pipeline_mode<synchronous>, transform_indices = @transform_1, window_bounds = array<i64: 80, 128>}, {pipeline_mode = #tpu.pipeline_mode<synchronous>, transform_indices = @transform_2, window_bounds = array<i64: 1, 128>}, {pipeline_mode = #tpu.pipeline_mode<synchronous>, transform_indices = @transform_3, window_bounds = array<i64: 128, 29>}, {pipeline_mode = #tpu.pipeline_mode<synchronous>, transform_indices = @transform_4, window_bounds = array<i64: 1, 29>}, {transform_indices = @transform_5, window_bounds = array<i64: 16, 29>}]} {
    %c0 = arith.constant 0 : index
    %c0_0 = arith.constant 0 : index
    %0 = vector.load %arg1[%c0, %c0_0] : memref<16x80xf32, #tpu.memory_space<vmem>>, vector<16x80xf32>
    %c0_1 = arith.constant 0 : index
    %c0_2 = arith.constant 0 : index
    %1 = vector.load %arg2[%c0_1, %c0_2] : memref<80x128xf32, #tpu.memory_space<vmem>>, vector<80x128xf32>
    %cst = arith.constant dense<0.000000e+00> : vector<16x128xf32>
    %2 = tpu.matmul %0, %1, %cst {dimension_numbers = #tpu.dot_dimension_numbers<[1], [0], [0], [1], [0, 0, 1, 1], [], []>} : vector<16x80xf32>, vector<80x128xf32>, vector<16x128xf32> -> vector<16x128xf32>
    %c0_3 = arith.constant 0 : index
    %c0_4 = arith.constant 0 : index
    %3 = vector.load %arg3[%c0_3, %c0_4] : memref<1x128xf32, #tpu.memory_space<vmem>>, vector<1x128xf32>
    %4 = vector.broadcast %3 : vector<1x128xf32> to vector<16x128xf32>
    %5 = arith.addf %2, %4 : vector<16x128xf32>
    %cst_5 = arith.constant 0.000000e+00 : f32
    %6 = vector.broadcast %cst_5 : f32 to vector<16x128xf32>
    %7 = arith.maximumf %5, %6 : vector<16x128xf32>
    %c0_6 = arith.constant 0 : index
    %c0_7 = arith.constant 0 : index
    %8 = vector.load %arg4[%c0_6, %c0_7] : memref<128x29xf32, #tpu.memory_space<vmem>>, vector<128x29xf32>
    %cst_8 = arith.constant dense<0.000000e+00> : vector<16x29xf32>
    %9 = tpu.matmul %7, %8, %cst_8 {dimension_numbers = #tpu.dot_dimension_numbers<[1], [0], [0], [1], [0, 0, 1, 1], [], []>} : vector<16x128xf32>, vector<128x29xf32>, vector<16x29xf32> -> vector<16x29xf32>
    %c0_9 = arith.constant 0 : index
    %c0_10 = arith.constant 0 : index
    %10 = vector.load %arg5[%c0_9, %c0_10] : memref<1x29xf32, #tpu.memory_space<vmem>>, vector<1x29xf32>
    %11 = vector.broadcast %10 : vector<1x29xf32> to vector<16x29xf32>
    %12 = arith.addf %9, %11 : vector<16x29xf32>
    %c0_11 = arith.constant 0 : index
    %c0_12 = arith.constant 0 : index
    %13 = vector.load %arg6[%c0_11, %c0_12] : memref<16x29xf32, #tpu.memory_space<vmem>>, vector<16x29xf32>
    tpu.vector_store %arg6[%c0_11, %c0_12], %12 {strides = array<i32>} : memref<16x29xf32, #tpu.memory_space<vmem>>, vector<16x29xf32>,
    return
  }
  func.func @transform_0(%arg0: i32) -> (i32, i32) {
    %c0_i32 = arith.constant 0 : i32
    %c0_i32_0 = arith.constant 0 : i32
    return %arg0, %c0_i32 : i32, i32
  }
  func.func @transform_1(%arg0: i32) -> (i32, i32) {
    %c0_i32 = arith.constant 0 : i32
    %c0_i32_0 = arith.constant 0 : i32
    %c0_i32_1 = arith.constant 0 : i32
    return %c0_i32, %c0_i32_0 : i32, i32
  }
  func.func @transform_2(%arg0: i32) -> (i32, i32) {
    %c0_i32 = arith.constant 0 : i32
    %c0_i32_0 = arith.constant 0 : i32
    %c0_i32_1 = arith.constant 0 : i32
    return %c0_i32, %c0_i32_0 : i32, i32
  }
  func.func @transform_3(%arg0: i32) -> (i32, i32) {
    %c0_i32 = arith.constant 0 : i32
    %c0_i32_0 = arith.constant 0 : i32
    %c0_i32_1 = arith.constant 0 : i32
    return %c0_i32, %c0_i32_0 : i32, i32
  }
  func.func @transform_4(%arg0: i32) -> (i32, i32) {
    %c0_i32 = arith.constant 0 : i32
    %c0_i32_0 = arith.constant 0 : i32
    %c0_i32_1 = arith.constant 0 : i32
    return %c0_i32, %c0_i32_0 : i32, i32
  }
  func.func @transform_5(%arg0: i32) -> (i32, i32) {
    %c0_i32 = arith.constant 0 : i32
    %c0_i32_0 = arith.constant 0 : i32
    return %arg0, %c0_i32 : i32, i32
  }
}

</mosaic_0001>

<bundles_post_ra>
// kernel: tpu_custom_call.1
= control target key start
LH: loop header
LB: loop body
LE: loop exit
PB: predicated region body
PF: predicated region fallthrough
CT: control target
= control target key end

     0   :  { %vm40_vm0 = vcmask 654336   ;;  %s486_s0 = inlined_call_operand.vmem [shape: f32[16,80], index: 0, kind: input, shape index: {}]   ;;  %s487_s1 = inlined_call_operand.vmem [shape: f32[80,128], index: 1, kind: input, shape index: {}]   ;;  %s488_s2 = inlined_call_operand.vmem [shape: f32[1,128], index: 2, kind: input, shape index: {}]   ;;  %s489_s3 = inlined_call_operand.vmem [shape: f32[128,29], index: 3, kind: input, shape index: {}]   ;;  %s490_s4 = inlined_call_operand.vmem [shape: f32[1,29], index: 4, kind: input, shape index: {}]   ;;  %s491_s5 = inlined_call_operand.hbm [shape: f32[16,29], index: 5, kind: output, shape index: {}]  }
   0x1   :  { %v32_v0 = vld [vmem:[%s487_s1 + $0x48] sm:$0xff]  ;;  %v31_v1 = vld [vmem:[%s487_s1 + $0x40] sm:$0xff]  ;;  %v30_v2 = vld [vmem:[%s487_s1 + $0x38] sm:$0xff] }
   0x2   :  { %275 = vmatprep.subr.mxu0 %v32_v0  ;;  %v21_v3 = vld [vmem:[%s486_s0] sm:$0xff]  ;;  %v29_v4 = vld [vmem:[%s487_s1 + $0x30] sm:$0xff]  ;;  %v139_v5 = vld [vmem:[%s489_s3 + $0x78] sm:$0xff] }
   0x3   :  { %276 = vmatpush3.msra.mxu0 %v32_v0  ;;  %295 = vmatprep.mubr.msk.f32.mxu0 %vm40_vm0, %v21_v3  ;;  %v138_v6 = vld [vmem:[%s489_s3 + $0x70] sm:$0xff]  ;;  %v28_v7 = vld [vmem:[%s487_s1 + $0x28] sm:$0xff]  ;;  %v27_v9 = vld [vmem:[%s487_s1 + $0x20] sm:$0xff] }
   0x4   :  { %277 = vmatprep.subr.mxu0 %v31_v1  ;;  %298 = vmatprep.subr.mxu1 %v139_v5  ;;  %v137_v8 = vld [vmem:[%s489_s3 + $0x68] sm:$0xff]  ;;  %v136_v10 = vld [vmem:[%s489_s3 + $0x60] sm:$0xff] }
   0x5   :  { %278 = vmatpush3.msra.mxu0 %v31_v1  ;;  %299 = vmatpush3.msra.mxu1 %v139_v5 }
   0x6   :  { %279 = vmatprep.subr.mxu0 %v30_v2  ;;  %300 = vmatprep.subr.mxu1 %v138_v6 }
   0x7   :  { %280 = vmatpush3.msra.mxu0 %v30_v2  ;;  %301 = vmatpush3.msra.mxu1 %v138_v6 }
   0x8   :  { %281 = vmatprep.subr.mxu0 %v29_v4 }
   0x9   :  { %282 = vmatpush3.msra.mxu0 %v29_v4 }
   0xa   :  { %10 = vsyncpa [#allocation3], 0  ;;  %283 = vmatprep.subr.mxu0 %v28_v7  ;;  %302 = vmatprep.subr.mxu1 %v137_v8  ;;  %v26_v11 = vld [vmem:[%s487_s1 + $0x18] sm:$0xff]  ;;  %v25_v13 = vld [vmem:[%s487_s1 + $0x10] sm:$0xff]  ;;  %vm222_vm1 = vcmask 236544  }
   0xb   :  { %284 = vmatpush3.msra.mxu0 %v28_v7  ;;  %303 = vmatpush3.msra.mxu1 %v137_v8  ;;  %v135_v12 = vld [vmem:[%s489_s3 + $0x58] sm:$0xff]  ;;  %v134_v14 = vld [vmem:[%s489_s3 + $0x50] sm:$0xff]  ;;  %v24_v15 = vld [vmem:[%s487_s1 + $0x8] sm:$0xff] }
   0xc   :  { %285 = vmatprep.subr.mxu0 %v27_v9  ;;  %304 = vmatprep.subr.mxu1 %v136_v10  ;;  %v133_v16 = vld [vmem:[%s489_s3 + $0x48] sm:$0xff]  ;;  %v23_v17 = vld [vmem:[%s487_s1] sm:$0xff]  ;;  %v131_v20 = vld [vmem:[%s489_s3 + $0x38] sm:$0xff] }
   0xd   :  { %286 = vmatpush3.msra.mxu0 %v27_v9  ;;  %305 = vmatpush3.msra.mxu1 %v136_v10  ;;  %v132_v18 = vld [vmem:[%s489_s3 + $0x40] sm:$0xff]  ;;  %v22_v19 = vld [vmem:[%s486_s0 + $0x8] sm:$0xff]  ;;  %v130_v21 = vld [vmem:[%s489_s3 + $0x30] sm:$0xff] }
   0xe   :  { %287 = vmatprep.subr.mxu0 %v26_v11  ;;  %306 = vmatprep.subr.mxu1 %v135_v12  ;;  %v129_v22 = vld [vmem:[%s489_s3 + $0x28] sm:$0xff]  ;;  %v128_v23 = vld [vmem:[%s489_s3 + $0x20] sm:$0xff]  ;;  %v127_v24 = vld [vmem:[%s489_s3 + $0x18] sm:$0xff] }
   0xf   :  { %288 = vmatpush3.msra.mxu0 %v26_v11  ;;  %307 = vmatpush3.msra.mxu1 %v135_v12  ;;  %v126_v25 = vld [vmem:[%s489_s3 + $0x10] sm:$0xff]  ;;  %v125_v26 = vld [vmem:[%s489_s3 + $0x8] sm:$0xff]  ;;  %v124_v27 = vld [vmem:[%s489_s3] sm:$0xff]  ;;  %s358_s3 = smov [#allocation2]  }
  0x10   :  { %289 = vmatprep.subr.mxu0 %v25_v13  ;;  %308 = vmatprep.subr.mxu1 %v134_v14  ;;  %v241_v28 = vld [vmem:[%s488_s2] ss:$0 sm:$0xff]  ;;  %s230_s26 = sshll.u32 %s358_s3, 4  ;;  %s231_s26 = int_to_ptr.vmem [resolvable:$true] %s230_s26 }
  0x11   :  { %290 = vmatpush3.msra.mxu0 %v25_v13  ;;  %309 = vmatpush3.msra.mxu1 %v134_v14  ;;  %v244_v35 = vld [vmem:[%s490_s4] ss:$0 sm:$0xff]  ;;  %s336_s2 = scalar_lea.vmem %s231_s26, 256  ;;  %p341_p1 = scmp.lt.s32.totalorder %s231_s26, %s231_s26 }
  0x12   :  { %291 = vmatprep.subr.mxu0 %v24_v15  ;;  %310 = vmatprep.subr.mxu1 %v133_v16  ;;  %p337_p0 = scmp.ne.s32.totalorder %s231_s26, %s336_s2  ;;  %p342_p2 = scmp.lt.s32.totalorder %s336_s2, %s336_s2 }
  0x13   :  { %292 = vmatpush3.msra.mxu0 %v24_v15  ;;  %311 = vmatpush3.msra.mxu1 %v133_v16 }
  0x14   :  { %293 = vmatprep.subr.mxu0 %v23_v17  ;;  %312 = vmatprep.subr.mxu1 %v132_v18  ;;  %p343_p3 = por %p342_p2, %p341_p1 }
  0x15   :  { %294 = vmatpush3.msra.mxu0 %v23_v17  ;;  %313 = vmatpush3.msra.mxu1 %v132_v18 }
  0x16   :  { %296 = vmatmul.mubr.msk.f32.vlgmr.msra.gmra.mxu0 %vm40_vm0, %v22_v19  ;;  %314 = vmatprep.subr.mxu1 %v131_v20  ;;  %p344_p4 = pnand %p343_p3, %p337_p0 }
  0x17   :  { %315 = vmatpush3.msra.mxu1 %v131_v20 }
  0x18   :  { %316 = vmatprep.subr.mxu1 %v130_v21 }
  0x19   :  { %317 = vmatpush3.msra.mxu1 %v130_v21 }
  0x1a   :  { %318 = vmatprep.subr.mxu1 %v129_v22 }
  0x1b   :  { %319 = vmatpush3.msra.mxu1 %v129_v22 }
  0x1c   :  { %320 = vmatprep.subr.mxu1 %v128_v23 }
  0x1d   :  { %321 = vmatpush3.msra.mxu1 %v128_v23 }
  0x1e   :  { %322 = vmatprep.subr.mxu1 %v127_v24 }
  0x1f   :  { %323 = vmatpush3.msra.mxu1 %v127_v24 }
  0x20   :  { %324 = vmatprep.subr.mxu1 %v126_v25 }
  0x21   :  { %325 = vmatpush3.msra.mxu1 %v126_v25 }
  0x22   :  { %326 = vmatprep.subr.mxu1 %v125_v26 }
  0x23   :  { %327 = vmatpush3.msra.mxu1 %v125_v26 }
  0x24   :  { %328 = vmatprep.subr.mxu1 %v124_v27 }
  0x25   :  { %329 = vmatpush3.msra.mxu1 %v124_v27 }
  0xd6   :  { %v297_v29 = vpop.f32.mrf.mxu0 }
  0xd7   :  { %v119_v30 = vadd.f32 %v297_v29, %v241_v28 }
  0xd8   :  { %v113_v31 = vpop.f32.mrf.mxu0 }
  0xd9   :  { %v114_v32 = vadd.f32 %v241_v28, %v113_v31  ;;  %v123_v34 = vmax.f32 %v119_v30, 0.0 }
  0xdb   :  { %v122_v33 = vmax.f32 %v114_v32, 0.0 }
  0xdd   :  { %330 = vmatprep.mubr.f32.mxu1 %v122_v33 }
  0xde   :  { %331 = vmatmul.mubr.f32.vlgmr.msra.gmra.mxu1 %v123_v34 }
 0x19e   :  { %v332_v36 = vpop.f32.mrf.mxu1 }
 0x19f   :  { %v219_v37 = vadd.f32 %v332_v36, %v244_v35 }
 0x1a0   :  { %v213_v38 = vpop.f32.mrf.mxu1 }
 0x1a1   :  { %224 = vst.msk [vmem:[#allocation2 + $0x8] sm:$0xff] %vm222_vm1, %v219_v37  ;;  %v214_v39 = vadd.f32 %v244_v35, %v213_v38 }
 0x1a3   :  { %223 = vst.msk [vmem:[#allocation2] sm:$0xff] %vm222_vm1, %v214_v39 }
 0x1a4   :  { %347 = shalt.err (!%p344_p4)
}
 0x1a5   :  { %s359_s27 = smov 128   ;;  %s360_s28 = smov 8  }
 0x1a6   :  { %236 = dma.vmem_to_hbm [thread:$0]  %s231_s26, 256, %s491_s5, [#allocation3], %s359_s27, %s359_s27, %s360_s28  }
 0x1a7   :  { %356 = dma.done.wait [#allocation3], 256  }
 0x1a8   :  { %357 = vsyncadd [#allocation3], 4294967040 }
 0x1a9   :  { %240 = vsyncpa [#allocation3], 1 }

</bundles_post_ra>
